<compile_context>
chip_gen: v7x
topology: tpu7x:2x2x1
jax: 0.10.0
libtpu: 0.0.40
codegen_flags: <defaults>
</compile_context>

<pallas_src>
import jax
import jax.numpy as jnp
from jax.experimental import pallas as pl
from jax.experimental.pallas import tpu as pltpu


def _round_up(x, m):
    return ((x + m - 1) // m) * m


def qcritic_kernel(obs_ref, act_ref,
                   w1o_ref, w1a_ref, b1_ref,
                   w2_ref, b2_ref,
                   wo_ref, bo_ref,
                   out_ref):
    # ---- layer 1: concat-free (two MXU matmuls accumulated in f32) + ReLU ----
    h1 = (jnp.dot(obs_ref[...], w1o_ref[...], preferred_element_type=jnp.float32)
          + jnp.dot(act_ref[...], w1a_ref[...], preferred_element_type=jnp.float32)
          + b1_ref[...])
    h1 = jnp.maximum(h1, 0.0)

    # ---- layer 2 + ReLU (bf16 operands, f32 accumulate) ----
    h2 = (jnp.dot(h1.astype(jnp.bfloat16), w2_ref[...],
                  preferred_element_type=jnp.float32)
          + b2_ref[...])
    h2 = jnp.maximum(h2, 0.0)

    # ---- output layer (padded to 128 lanes -> unmasked full-lane store) ----
    out_ref[...] = (jnp.dot(h2.astype(jnp.bfloat16), wo_ref[...],
                            preferred_element_type=jnp.float32)
                    + bo_ref[...]).astype(out_ref.dtype)


def qcritic_forward(obs, action, params, *, tb=256):
    """obs: [B, dim_obs] f32, action: [B, dim_action] f32 -> q: [B, 1] f32."""
    w1, b1, w2, b2, wo, bo = params
    B, dim_obs = obs.shape
    dim_act = action.shape[1]

    H1 = w1.shape[1]            # first hidden width (64)
    H2 = w2.shape[1]            # second hidden width (64)
    H1p = _round_up(H1, 128)    # padded to full 128-lane vregs
    H2p = _round_up(H2, 128)
    OP = 128                    # lane-dense output slab (col 0 is the real q)

    # batch tile: largest multiple-of-8 tile up to `tb`
    TB = min(tb, _round_up(B, 8))
    B_pad = _round_up(B, TB)
    grid = (B_pad // TB,)

    bf = jnp.bfloat16
    # Split W1 by input source (rows 0:dim_obs <-> obs, dim_obs: <-> action),
    # zero-pad hidden/output dims, cast matmul operands to bf16.
    w1o = jnp.pad(w1[:dim_obs], ((0, 0), (0, H1p - H1))).astype(bf)
    w1a = jnp.pad(w1[dim_obs:], ((0, 0), (0, H1p - H1))).astype(bf)
    b1p = jnp.pad(b1, ((0, 0), (0, H1p - H1))).astype(jnp.float32)
    w2p = jnp.pad(w2, ((0, H1p - H1), (0, H2p - H2))).astype(bf)
    b2p = jnp.pad(b2, ((0, 0), (0, H2p - H2))).astype(jnp.float32)
    wop = jnp.pad(wo, ((0, H2p - H2), (0, OP - wo.shape[1]))).astype(bf)
    bop = jnp.pad(bo, ((0, 0), (0, OP - bo.shape[1]))).astype(jnp.float32)

    obs_p = jnp.pad(obs, ((0, B_pad - B), (0, 0))).astype(bf)
    act_p = jnp.pad(action, ((0, B_pad - B), (0, 0))).astype(bf)

    # batch-tiled activations; weights pinned in VMEM via constant block index
    batch_spec = lambda feat: pl.BlockSpec((TB, feat), lambda i: (i, 0))
    const_spec = lambda arr: pl.BlockSpec(arr.shape, lambda i: (0, 0))

    out = pl.pallas_call(
        qcritic_kernel,
        out_shape=jax.ShapeDtypeStruct((B_pad, OP), jnp.float32),
        grid=grid,
        in_specs=[
            batch_spec(dim_obs), batch_spec(dim_act),
            const_spec(w1o), const_spec(w1a), const_spec(b1p),
            const_spec(w2p), const_spec(b2p),
            const_spec(wop), const_spec(bop),
        ],
        out_specs=pl.BlockSpec((TB, OP), lambda i: (i, 0)),
        compiler_params=pltpu.CompilerParams(
            dimension_semantics=("parallel",)),
    )(obs_p, act_p, w1o, w1a, b1p, w2p, b2p, wop, bop)

    return out[:B, :1]


def xavier_uniform(key, fan_in, fan_out):
    # matches torch.nn.init.xavier_uniform_ on a (fan_out, fan_in) weight;
    # stored transposed as (fan_in, fan_out).
    limit = jnp.sqrt(6.0 / (fan_in + fan_out))
    return jax.random.uniform(key, (fan_in, fan_out), jnp.float32, -limit, limit)


def init_qcritic_params(key, dim_obs, dim_action, dims_hidden=(64, 64)):
    dims = (dim_obs + dim_action,) + tuple(dims_hidden) + (1,)
    keys = jax.random.split(key, len(dims) - 1)
    params = []
    for k, d_in, d_out in zip(keys, dims[:-1], dims[1:]):
        w = xavier_uniform(k, d_in, d_out)          # [in, out]
        b = jnp.zeros((1, d_out), jnp.float32)      # zeros_ init, kept 2-D
        params.extend([w, b])
    return tuple(params)


def _ref_f32(obs, action, params):
    w1, b1, w2, b2, wo, bo = params
    x = jnp.concatenate([obs, action], axis=1)
    h1 = jnp.maximum(x @ w1 + b1, 0.0)
    h2 = jnp.maximum(h1 @ w2 + b2, 0.0)
    return h2 @ wo + bo


def _ref_bf16(obs, action, params):
    # same math as the kernel: bf16 matmul operands, f32 accumulation
    w1, b1, w2, b2, wo, bo = params
    bf = jnp.bfloat16
    d_obs = obs.shape[1]
    h1 = (jnp.dot(obs.astype(bf), w1[:d_obs].astype(bf),
                  preferred_element_type=jnp.float32)
          + jnp.dot(action.astype(bf), w1[d_obs:].astype(bf),
                    preferred_element_type=jnp.float32) + b1)
    h1 = jnp.maximum(h1, 0.0)
    h2 = jnp.maximum(jnp.dot(h1.astype(bf), w2.astype(bf),
                             preferred_element_type=jnp.float32) + b2, 0.0)
    return jnp.dot(h2.astype(bf), wo.astype(bf),
                   preferred_element_type=jnp.float32) + bo


if __name__ == "__main__":
    # batch large enough (and non-multiple of the tile) to exercise the
    # batch-tiled, padded grid; feature sizes match a typical SAC critic.
    B, dim_obs, dim_action = 300, 12, 4
    dims_hidden = (64, 64)

    key = jax.random.PRNGKey(0)
    k_obs, k_act, k_par = jax.random.split(key, 3)

    obs = jax.random.normal(k_obs, (B, dim_obs), jnp.float32)
    action = jax.random.normal(k_act, (B, dim_action), jnp.float32)
    params = init_qcritic_params(k_par, dim_obs, dim_action, dims_hidden)

    q = qcritic_forward(obs, action, params, tb=128)   # -> grid of 3 batch tiles
    jax.block_until_ready(q)
    assert q.shape == (B, 1)

    # tight check vs. a reference using identical bf16/f32 mixed precision
    q_bf = _ref_bf16(obs, action, params)
    assert jnp.allclose(q, q_bf, atol=2e-3, rtol=2e-3), "mismatch vs bf16 reference"

    # sanity check vs. full-f32 reference (bf16 rounding only)
    q_f32 = _ref_f32(obs, action, params)
    assert jnp.allclose(q, q_f32, atol=1e-1, rtol=5e-2), "mismatch vs f32 reference"

    print("KERNEL_OK")
</pallas_src>

<mosaic_0001>
module attributes {stable_mosaic.version = 11 : i64} {
  func.func @qcritic_kernel(%arg0: i32, %arg1: memref<128x12xbf16, #tpu.memory_space<vmem>>, %arg2: memref<128x4xbf16, #tpu.memory_space<vmem>>, %arg3: memref<12x128xbf16, #tpu.memory_space<vmem>>, %arg4: memref<4x128xbf16, #tpu.memory_space<vmem>>, %arg5: memref<1x128xf32, #tpu.memory_space<vmem>>, %arg6: memref<128x128xbf16, #tpu.memory_space<vmem>>, %arg7: memref<1x128xf32, #tpu.memory_space<vmem>>, %arg8: memref<128x128xbf16, #tpu.memory_space<vmem>>, %arg9: memref<1x128xf32, #tpu.memory_space<vmem>>, %arg10: memref<128x128xf32, #tpu.memory_space<vmem>>) attributes {dimension_semantics = [#tpu.dimension_semantics<parallel>], iteration_bounds = array<i64: 3>, scalar_prefetch = 0 : i64, scratch_operands = 0 : i64, tpu.core_type = #tpu.core_type<tc>, window_params = [{transform_indices = @transform_0, window_bounds = array<i64: 128, 12>}, {transform_indices = @transform_1, window_bounds = array<i64: 128, 4>}, {pipeline_mode = #tpu.pipeline_mode<synchronous>, transform_indices = @transform_2, window_bounds = array<i64: 12, 128>}, {pipeline_mode = #tpu.pipeline_mode<synchronous>, transform_indices = @transform_3, window_bounds = array<i64: 4, 128>}, {pipeline_mode = #tpu.pipeline_mode<synchronous>, transform_indices = @transform_4, window_bounds = array<i64: 1, 128>}, {pipeline_mode = #tpu.pipeline_mode<synchronous>, transform_indices = @transform_5, window_bounds = array<i64: 128, 128>}, {pipeline_mode = #tpu.pipeline_mode<synchronous>, transform_indices = @transform_6, window_bounds = array<i64: 1, 128>}, {pipeline_mode = #tpu.pipeline_mode<synchronous>, transform_indices = @transform_7, window_bounds = array<i64: 128, 128>}, {pipeline_mode = #tpu.pipeline_mode<synchronous>, transform_indices = @transform_8, window_bounds = array<i64: 1, 128>}, {transform_indices = @transform_9, window_bounds = array<i64: 128, 128>}]} {
    %c0 = arith.constant 0 : index
    %c0_0 = arith.constant 0 : index
    %0 = vector.load %arg1[%c0, %c0_0] : memref<128x12xbf16, #tpu.memory_space<vmem>>, vector<128x12xbf16>
    %c0_1 = arith.constant 0 : index
    %c0_2 = arith.constant 0 : index
    %1 = vector.load %arg3[%c0_1, %c0_2] : memref<12x128xbf16, #tpu.memory_space<vmem>>, vector<12x128xbf16>
    %cst = arith.constant dense<0.000000e+00> : vector<128x128xf32>
    %2 = tpu.matmul %0, %1, %cst {dimension_numbers = #tpu.dot_dimension_numbers<[1], [0], [0], [1], [0, 0, 1, 1], [], []>} : vector<128x12xbf16>, vector<12x128xbf16>, vector<128x128xf32> -> vector<128x128xf32>
    %c0_3 = arith.constant 0 : index
    %c0_4 = arith.constant 0 : index
    %3 = vector.load %arg2[%c0_3, %c0_4] : memref<128x4xbf16, #tpu.memory_space<vmem>>, vector<128x4xbf16>
    %c0_5 = arith.constant 0 : index
    %c0_6 = arith.constant 0 : index
    %4 = vector.load %arg4[%c0_5, %c0_6] : memref<4x128xbf16, #tpu.memory_space<vmem>>, vector<4x128xbf16>
    %cst_7 = arith.constant dense<0.000000e+00> : vector<128x128xf32>
    %5 = tpu.matmul %3, %4, %cst_7 {dimension_numbers = #tpu.dot_dimension_numbers<[1], [0], [0], [1], [0, 0, 1, 1], [], []>} : vector<128x4xbf16>, vector<4x128xbf16>, vector<128x128xf32> -> vector<128x128xf32>
    %6 = arith.addf %2, %5 : vector<128x128xf32>
    %c0_8 = arith.constant 0 : index
    %c0_9 = arith.constant 0 : index
    %7 = vector.load %arg5[%c0_8, %c0_9] : memref<1x128xf32, #tpu.memory_space<vmem>>, vector<1x128xf32>
    %8 = vector.broadcast %7 : vector<1x128xf32> to vector<128x128xf32>
    %9 = arith.addf %6, %8 : vector<128x128xf32>
    %cst_10 = arith.constant 0.000000e+00 : f32
    %10 = vector.broadcast %cst_10 : f32 to vector<128x128xf32>
    %11 = arith.maximumf %9, %10 : vector<128x128xf32>
    %12 = arith.truncf %11 : vector<128x128xf32> to vector<128x128xbf16>
    %c0_11 = arith.constant 0 : index
    %c0_12 = arith.constant 0 : index
    %13 = vector.load %arg6[%c0_11, %c0_12] : memref<128x128xbf16, #tpu.memory_space<vmem>>, vector<128x128xbf16>
    %cst_13 = arith.constant dense<0.000000e+00> : vector<128x128xf32>
    %14 = tpu.matmul %12, %13, %cst_13 {dimension_numbers = #tpu.dot_dimension_numbers<[1], [0], [0], [1], [0, 0, 1, 1], [], []>} : vector<128x128xbf16>, vector<128x128xbf16>, vector<128x128xf32> -> vector<128x128xf32>
    %c0_14 = arith.constant 0 : index
    %c0_15 = arith.constant 0 : index
    %15 = vector.load %arg7[%c0_14, %c0_15] : memref<1x128xf32, #tpu.memory_space<vmem>>, vector<1x128xf32>
    %16 = vector.broadcast %15 : vector<1x128xf32> to vector<128x128xf32>
    %17 = arith.addf %14, %16 : vector<128x128xf32>
    %cst_16 = arith.constant 0.000000e+00 : f32
    %18 = vector.broadcast %cst_16 : f32 to vector<128x128xf32>
    %19 = arith.maximumf %17, %18 : vector<128x128xf32>
    %20 = arith.truncf %19 : vector<128x128xf32> to vector<128x128xbf16>
    %c0_17 = arith.constant 0 : index
    %c0_18 = arith.constant 0 : index
    %21 = vector.load %arg8[%c0_17, %c0_18] : memref<128x128xbf16, #tpu.memory_space<vmem>>, vector<128x128xbf16>
    %cst_19 = arith.constant dense<0.000000e+00> : vector<128x128xf32>
    %22 = tpu.matmul %20, %21, %cst_19 {dimension_numbers = #tpu.dot_dimension_numbers<[1], [0], [0], [1], [0, 0, 1, 1], [], []>} : vector<128x128xbf16>, vector<128x128xbf16>, vector<128x128xf32> -> vector<128x128xf32>
    %c0_20 = arith.constant 0 : index
    %c0_21 = arith.constant 0 : index
    %23 = vector.load %arg9[%c0_20, %c0_21] : memref<1x128xf32, #tpu.memory_space<vmem>>, vector<1x128xf32>
    %24 = vector.broadcast %23 : vector<1x128xf32> to vector<128x128xf32>
    %25 = arith.addf %22, %24 : vector<128x128xf32>
    %c0_22 = arith.constant 0 : index
    %c0_23 = arith.constant 0 : index
    %26 = vector.load %arg10[%c0_22, %c0_23] : memref<128x128xf32, #tpu.memory_space<vmem>>, vector<128x128xf32>
    tpu.vector_store %arg10[%c0_22, %c0_23], %25 {strides = array<i32>} : memref<128x128xf32, #tpu.memory_space<vmem>>, vector<128x128xf32>,
    return
  }
  func.func @transform_0(%arg0: i32) -> (i32, i32) {
    %c0_i32 = arith.constant 0 : i32
    %c0_i32_0 = arith.constant 0 : i32
    return %arg0, %c0_i32 : i32, i32
  }
  func.func @transform_1(%arg0: i32) -> (i32, i32) {
    %c0_i32 = arith.constant 0 : i32
    %c0_i32_0 = arith.constant 0 : i32
    return %arg0, %c0_i32 : i32, i32
  }
  func.func @transform_2(%arg0: i32) -> (i32, i32) {
    %c0_i32 = arith.constant 0 : i32
    %c0_i32_0 = arith.constant 0 : i32
    %c0_i32_1 = arith.constant 0 : i32
    return %c0_i32, %c0_i32_0 : i32, i32
  }
  func.func @transform_3(%arg0: i32) -> (i32, i32) {
    %c0_i32 = arith.constant 0 : i32
    %c0_i32_0 = arith.constant 0 : i32
    %c0_i32_1 = arith.constant 0 : i32
    return %c0_i32, %c0_i32_0 : i32, i32
  }
  func.func @transform_4(%arg0: i32) -> (i32, i32) {
    %c0_i32 = arith.constant 0 : i32
    %c0_i32_0 = arith.constant 0 : i32
    %c0_i32_1 = arith.constant 0 : i32
    return %c0_i32, %c0_i32_0 : i32, i32
  }
  func.func @transform_5(%arg0: i32) -> (i32, i32) {
    %c0_i32 = arith.constant 0 : i32
    %c0_i32_0 = arith.constant 0 : i32
    %c0_i32_1 = arith.constant 0 : i32
    return %c0_i32, %c0_i32_0 : i32, i32
  }
  func.func @transform_6(%arg0: i32) -> (i32, i32) {
    %c0_i32 = arith.constant 0 : i32
    %c0_i32_0 = arith.constant 0 : i32
    %c0_i32_1 = arith.constant 0 : i32
    return %c0_i32, %c0_i32_0 : i32, i32
  }
  func.func @transform_7(%arg0: i32) -> (i32, i32) {
    %c0_i32 = arith.constant 0 : i32
    %c0_i32_0 = arith.constant 0 : i32
    %c0_i32_1 = arith.constant 0 : i32
    return %c0_i32, %c0_i32_0 : i32, i32
  }
  func.func @transform_8(%arg0: i32) -> (i32, i32) {
    %c0_i32 = arith.constant 0 : i32
    %c0_i32_0 = arith.constant 0 : i32
    %c0_i32_1 = arith.constant 0 : i32
    return %c0_i32, %c0_i32_0 : i32, i32
  }
  func.func @transform_9(%arg0: i32) -> (i32, i32) {
    %c0_i32 = arith.constant 0 : i32
    %c0_i32_0 = arith.constant 0 : i32
    return %arg0, %c0_i32 : i32, i32
  }
}

</mosaic_0001>

<bundles_post_ra>
// kernel: tpu_custom_call.1
= control target key start
LH: loop header
LB: loop body
LE: loop exit
PB: predicated region body
PF: predicated region fallthrough
CT: control target
= control target key end

     0   :  { %14 = vsyncpa [#allocation3], 0  ;;  %s1937_s0 = inlined_call_operand.vmem [shape: bf16[384,12], index: 0, kind: input, shape index: {}]   ;;  %s1938_s1 = inlined_call_operand.vmem [shape: bf16[384,4], index: 1, kind: input, shape index: {}]   ;;  %s1939_s2 = inlined_call_operand.vmem [shape: bf16[12,128], index: 2, kind: input, shape index: {}]   ;;  %s1940_s3 = inlined_call_operand.vmem [shape: bf16[4,128], index: 3, kind: input, shape index: {}]   ;;  %s1941_s4 = inlined_call_operand.vmem [shape: f32[1,128], index: 4, kind: input, shape index: {}]   ;;  %s1942_s5 = inlined_call_operand.vmem [shape: bf16[128,128], index: 5, kind: input, shape index: {}]   ;;  %s1943_s6 = inlined_call_operand.vmem [shape: f32[1,128], index: 6, kind: input, shape index: {}]   ;;  %s1944_s7 = inlined_call_operand.vmem [shape: bf16[128,128], index: 7, kind: input, shape index: {}]   ;;  %s1945_s8 = inlined_call_operand.vmem [shape: f32[1,128], index: 8, kind: input, shape index: {}]   ;;  %s1946_s9 = inlined_call_operand.hbm [shape: f32[384,128], index: 9, kind: output, shape index: {}]  }
   0x1   :  { %16 = vsyncpa [#allocation3 + $0x1], 0  ;;  %s1682_s30 = smov 0   ;;  %s1684_s10 = smov 0  }
   0x2   :  { %s1686_s11 = smov 0   ;;  %s1688_s12 = smov 0  }
   0x3 LB: > { %s1703_s13 = sadd.s32 4294967295, %s1627_s12   ;;  %s1240_s14 = sadd.s32 4294967294, %s1627_s12   ;;  %s1627_s12 = sphi %s1688_s12, %s1952_s12   ;;  %s1623_s11 = sphi %s1686_s11, %s1951_s11   ;;  %s1619_s10 = sphi %s1684_s10, %s1950_s10   ;;  %s1615_s30 = sphi %s1682_s30, %s1949_s30  }
   0x4   : > { %s1707_s15 = sadd.s32 1, %s1627_s12   ;;  %s228_s16 = sadd.s32 1, %s1623_s11 }
   0x5   : > { %s225_s17 = ssub.s32 %s1627_s12, %s1707_s15  ;;  %p238_p0 = scmp.ne.s32.totalorder %s1623_s11, %s1619_s10 }
   0x6   : > { %p226_p1 = scmp.eq.s32.totalorder %s225_s17, 0  ;;  %p239_p2 = scmp.eq.s32.totalorder %s1703_s13, 2 }
   0x7   : > { %p244_p3 = scmp.ne.s32.totalorder %s1619_s10, %s1615_s30  ;;  %p245_p4 = scmp.eq.s32.totalorder %s1240_s14, 2 }
   0x8   : > { %s1718_s18 = scalar_select %p226_p1, %s1623_s11, %s228_s16  }
   0x9   : > { %p1720_p5 = por %p239_p2, %p238_p0  ;;  %p1724_p6 = por %p245_p4, %p244_p3 }
   0xa   : > { %p1243_p7 = scmp.ge.s32.totalorder %s1627_s12, 1  ;;  %p302_p8 = scmp.lt.s32.totalorder %s1627_s12, 4 }
   0xc   : > { %p303_p9 = pnand %p1243_p7, %p302_p8 }
   0xd   : > { %v391_v0 = vld [vmem:[%s1940_s3] sm:$0x3] (!%p303_p9)  ;;  %vm457_vm0 = vcmask (!%p303_p9), 1041408   ;;  %s1245_s23 = sshll.u32 (!%p303_p9), %s1703_s13, 4  ;;  %vm628_vm1 = vcmask (!%p303_p9), 1045504   ;;  %v1550_v4 = vld [vmem:[%s1942_s5 + $0x8] sm:$0xff] (!%p303_p9)  }
   0xe   : > { %306 = sbr.rel (%p303_p9) target bundleno = 758 (0x2f6), region = 56  ;;  %1489 = vmatprep.subr.msk.bf16.mxu0 (!%p303_p9), %vm457_vm0, %v391_v0  ;;  %v459_v1 = vsel (!%p303_p9), %vm457_vm0, %v391_v0, 0  ;;  %p344_p10 = scmp.lt.s32.totalorder (!%p303_p9), %s1245_s23, 47  ;;  %v1533_v2 = vld [vmem:[%s1939_s2] sm:$0x3f] (!%p303_p9)   ;;  %vm432_vm2 = vcmask (!%p303_p9), 31744  }
   0xf   : > { %1358 = vmatpush3.bf16.msra.mxu0 (!%p303_p9), %v459_v1  ;;  %v1549_v3 = vld [vmem:[%s1942_s5] sm:$0xff] (!%p303_p9)   ;;  %v1551_v5 = vld [vmem:[%s1942_s5 + $0x10] sm:$0xff] (!%p303_p9)   ;;  %v630_v8 = vsel (!%p303_p9), %vm628_vm1, %v1533_v2, 0  ;;  %v1552_v10 = vld [vmem:[%s1942_s5 + $0x18] sm:$0xff] (!%p303_p9)   ;;  %vm603_vm3 = vcmask (!%p303_p9), 97280   ;;  %s340_s21 = sand.u32 (!%p303_p9), 1, %s1619_s10  }
  0x10   : > { %1490 = vmatprep.subr.msk.bf16.mxu0 (!%p303_p9), %vm628_vm1, %v1533_v2  ;;  %1393 = vmatprep.subr.bf16.mxu1 (!%p303_p9), %v1549_v3  ;;  %v1553_v15 = vld [vmem:[%s1942_s5 + $0x20] sm:$0xff] (!%p303_p9)   ;;  %v1554_v16 = vld [vmem:[%s1942_s5 + $0x28] sm:$0xff] (!%p303_p9)   ;;  %v1555_v26 = vld [vmem:[%s1942_s5 + $0x30] sm:$0xff] (!%p303_p9)   ;;  %s1244_s22 = sshll.u32 (!%p303_p9), %s340_s21, 7  ;;  %s1306_s26 = sshll.u32 (!%p303_p9), %s1703_s13, 11 }
  0x11   : > { %1394 = vmatpush3.bf16.msra.mxu1 (!%p303_p9), %v1549_v3  ;;  %v1556_v27 = vld [vmem:[%s1942_s5 + $0x38] sm:$0xff] (!%p303_p9)   ;;  %v1557_v28 = vld [vmem:[%s1944_s7] sm:$0xff] (!%p303_p9)   ;;  %v1558_v29 = vld [vmem:[%s1944_s7 + $0x8] sm:$0xff] (!%p303_p9)   ;;  %s1867_s25 = scalar_lea.vmem (!%p303_p9), [#allocation2], %s1244_s22  ;;  %s1887_s16 = scalar_lea.hbm (!%p303_p9), %s1946_s9, %s1306_s26 }
  0x12   : > { %1395 = vmatprep.subr.bf16.mxu1 (!%p303_p9), %v1550_v4  ;;  %v1559_v30 = vld [vmem:[%s1944_s7 + $0x10] sm:$0xff] (!%p303_p9)   ;;  %v1807_v31 = vld [vmem:[%s1944_s7 + $0x18] sm:$0xff] (!%p303_p9)   ;;  %v1813_v32 = vld [vmem:[%s1944_s7 + $0x20] sm:$0xff] (!%p303_p9)   ;;  %s1166_s27 = sshll.u32 (!%p303_p9), %s1867_s25, 4  ;;  %s1896_s13 = scalar_lea.sflag (!%p303_p9), [#allocation3], %s340_s21  ;;  %s1889_s27 = int_to_ptr.vmem [resolvable:$true] %s1166_s27 }
  0x13   : > { %v1820_v33 = vld [vmem:[%s1944_s7 + $0x28] sm:$0xff] (!%p303_p9)   ;;  %v1828_v34 = vld [vmem:[%s1941_s4] ss:$0 sm:$0xff] (!%p303_p9)  ;;  %s1565_s17 = scalar_lea.vmem (!%p303_p9), %s1889_s27, 2048 }
  0x14   : > { %p1566_p11 = scmp.ne.s32.totalorder (!%p303_p9), %s1889_s27, %s1565_s17 }
  0x15   : > { %s1954_s23 = smov (!%p344_p10, %s1245_s23), 47  ;;  %1396 = vmatpush3.bf16.msra.mxu1 %v1550_v4 }
  0x16   : > { %s1246_s14 = sshll.u32 %s1954_s23, 2  ;;  %1397 = vmatprep.subr.bf16.mxu1 %v1551_v5  ;;  %p1567_p12 = pnand %p1566_p11, %p1720_p5 }
  0x17   : > { %s353_s24 = scalar_lea.vmem %s1938_s1, %s1246_s14  ;;  %s1760_s28 = scalar_lea.vmem %s1937_s0, %s1246_s14 }
  0x18   : > { %v1532_v6 = vld [vmem:[%s353_s24] sm:$0xff]   ;;  %v1534_v7 = vld [vmem:[%s353_s24 + $0x8] sm:$0xff]   ;;  %v1535_v9 = vld [vmem:[%s353_s24 + $0x10] sm:$0xff]   ;;  %p1568_p13 = pneg %p1567_p12  ;;  %s1629_s14 = smov [#allocation2]  }
  0x19   : > { %1359 = vmatprep.mubr.msk.bf16.mxu0 %vm432_vm2, %v1532_v6  ;;  %1398 = vmatpush3.bf16.msra.mxu1 %v1551_v5  ;;  %v1536_v11 = vld [vmem:[%s353_s24 + $0x18] sm:$0xff]   ;;  %v1537_v12 = vld [vmem:[%s353_s24 + $0x20] sm:$0xff]   ;;  %v1538_v13 = vld [vmem:[%s353_s24 + $0x28] sm:$0xff]   ;;  %s1569_s22 = sshll.u32 %s1629_s14, 4  ;;  %s1570_s22 = int_to_ptr.vmem [resolvable:$false] %s1569_s22 }
  0x1a   : > { %1360 = vmatmul.mubr.msk.bf16.vlgmr.msra.gmra.mrb[0].mxu0 %vm432_vm2, %v1534_v7  ;;  %1399 = vmatprep.subr.bf16.mxu1 %v1552_v10  ;;  %v1539_v14 = vld [vmem:[%s353_s24 + $0x30] sm:$0xff]   ;;  %v1540_v17 = vld [vmem:[%s353_s24 + $0x38] sm:$0xff]   ;;  %v1541_v18 = vld [vmem:[%s1760_s28] sm:$0xff]   ;;  %s1571_s24 = scalar_lea.vmem %s1570_s22, 4096  ;;  %p1572_p0 = scmp.lt.s32.totalorder %s1889_s27, %s1570_s22 }
  0x1b   : > { %1376 = vmatpush3.bf16.msra.mxu0 %v630_v8  ;;  %1363 = vmatprep.mubr.msk.bf16.mxu0 %vm432_vm2, %v1535_v9  ;;  %v1542_v19 = vld [vmem:[%s1760_s28 + $0x8] sm:$0xff]   ;;  %v1543_v20 = vld [vmem:[%s1760_s28 + $0x10] sm:$0xff]   ;;  %v1544_v21 = vld [vmem:[%s1760_s28 + $0x18] sm:$0xff]   ;;  %p1573_p1 = scmp.lt.s32.totalorder %s1571_s24, %s1565_s17 }
  0x1c   : > { %v1545_v22 = vld [vmem:[%s1760_s28 + $0x20] sm:$0xff]   ;;  %v1546_v23 = vld [vmem:[%s1760_s28 + $0x28] sm:$0xff]   ;;  %v1547_v24 = vld [vmem:[%s1760_s28 + $0x30] sm:$0xff]   ;;  %1425 = vmatprep.subr.bf16.mxu0 %v1557_v28 }
  0x1d   : > { %1400 = vmatpush3.bf16.msra.mxu1 %v1552_v10  ;;  %v1548_v25 = vld [vmem:[%s1760_s28 + $0x38] sm:$0xff]   ;;  %p1574_p2 = por %p1573_p1, %p1572_p0 }
  0x1e   : > { %1401 = vmatprep.subr.bf16.mxu1 %v1553_v15 }
  0x1f   : > { %p1575_p3 = pnand %p1574_p2, %p1568_p13 }
  0x21   : > { %1402 = vmatpush3.bf16.msra.mxu1 %v1553_v15 }
  0x22   : > { %1364 = vmatmul.mubr.msk.bf16.gmra.mrb[4].mxu0 %vm432_vm2, %v1536_v11  ;;  %1403 = vmatprep.subr.bf16.mxu1 %v1554_v16 }
  0x23   : > { %1367 = vmatprep.mubr.msk.bf16.mxu0 %vm432_vm2, %v1537_v12 }
  0x25   : > { %1404 = vmatpush3.bf16.msra.mxu1 %v1554_v16 }
  0x26   : > { %1405 = vmatprep.subr.bf16.mxu1 %v1555_v26 }
  0x29   : > { %1406 = vmatpush3.bf16.msra.mxu1 %v1555_v26 }
  0x2a   : > { %1368 = vmatmul.mubr.msk.bf16.gmra.mrb[8].mxu0 %vm432_vm2, %v1538_v13  ;;  %1407 = vmatprep.subr.bf16.mxu1 %v1556_v27 }
  0x2b   : > { %1371 = vmatprep.mubr.msk.bf16.mxu0 %vm432_vm2, %v1539_v14 }
  0x2d   : > { %1408 = vmatpush3.bf16.msra.mxu1 %v1556_v27  ;;  %v1563_v27 = vld [vmem:[%s1944_s7 + $0x30] sm:$0xff]  }
  0x2e   : > { %1457 = vmatprep.subr.bf16.mxu1 %v1557_v28 }
  0x32   : > { %1372 = vmatmul.mubr.msk.bf16.gmra.mrb[12].mxu0 %vm432_vm2, %v1540_v17 }
  0x33   : > { %1377 = vmatprep.mubr.msk.bf16.mxu0 %vm603_vm3, %v1541_v18 }
  0x3a   : > { %1378 = vmatmul.mubr.msk.bf16.vlgmr.msra.gmra.mrb[0].mxu0 %vm603_vm3, %v1542_v19 }
  0x3b   : > { %1381 = vmatprep.mubr.msk.bf16.mxu0 %vm603_vm3, %v1543_v20  ;;  %1426 = vmatpush3.bf16.msra.mxu0 %v1557_v28 }
  0x3c   : > { %1427 = vmatprep.subr.bf16.mxu0 %v1558_v29 }
  0x3f   : > { %1428 = vmatpush3.bf16.msra.mxu0 %v1558_v29 }
  0x40   : > { %1429 = vmatprep.subr.bf16.mxu0 %v1559_v30 }
  0x42   : > { %1382 = vmatmul.mubr.msk.bf16.gmra.mrb[4].mxu0 %vm603_vm3, %v1544_v21 }
  0x43   : > { %1385 = vmatprep.mubr.msk.bf16.mxu0 %vm603_vm3, %v1545_v22  ;;  %1430 = vmatpush3.bf16.msra.mxu0 %v1559_v30 }
  0x44   : > { %1431 = vmatprep.subr.bf16.mxu0 %v1807_v31 }
  0x47   : > { %1432 = vmatpush3.bf16.msra.mxu0 %v1807_v31 }
  0x48   : > { %1433 = vmatprep.subr.bf16.mxu0 %v1813_v32 }
  0x4a   : > { %1386 = vmatmul.mubr.msk.bf16.gmra.mrb[8].mxu0 %vm603_vm3, %v1546_v23 }
  0x4b   : > { %1389 = vmatprep.mubr.msk.bf16.mxu0 %vm603_vm3, %v1547_v24  ;;  %1434 = vmatpush3.bf16.msra.mxu0 %v1813_v32 }
  0x4c   : > { %1435 = vmatprep.subr.bf16.mxu0 %v1820_v33 }
  0x4f   : > { %1436 = vmatpush3.bf16.msra.mxu0 %v1820_v33 }
  0x50   : > { %1437 = vmatprep.subr.bf16.mxu0 %v1563_v27 }
  0x52   : > { %1390 = vmatmul.mubr.msk.bf16.gmra.mrb[12].mxu0 %vm603_vm3, %v1548_v25 }
  0x53   : > { %1438 = vmatpush3.bf16.msra.mxu0 %v1563_v27 }
 0x10d   : > { %v1379_v35 = vpop.f32.mrb[0].mxu0 }
 0x10e   : > { %v738_v36 = vadd.f32 %v1379_v35, %v1828_v34  ;;  %v666_v37 = vpop.f32.mrb[1].mxu0 }
 0x10f   : > { %v736_v38 = vadd.f32 %v1828_v34, %v666_v37  ;;  %v1380_v39 = vpop.f32.mrb[2].mxu0 }
 0x110   : > { %v739_v40 = vadd.f32 %v1380_v39, %v1828_v34  ;;  %v669_v41 = vpop.f32.mrb[3].mxu0  ;;  %v754_v43 = vmax.f32 %v738_v36, 0.0 }
 0x111   : > { %v737_v42 = vadd.f32 %v1828_v34, %v669_v41  ;;  %v752_v45 = vmax.f32 %v736_v38, 0.0 }
 0x112   : > { %v755_v44 = vmax.f32 %v739_v40, 0.0 }
 0x113   : > { %v753_v46 = vmax.f32 %v737_v42, 0.0 }
 0x114   : > { %v769_v47 = vpack.c.bf16 %v755_v44, %v754_v43 }
 0x115   : > { %v1383_v48 = vpop.f32.mrb[4].mxu0  ;;  %v768_v49 = vpack.c.bf16 %v753_v46, %v752_v45 }
 0x116   : > { %v742_v50 = vadd.f32 %v1383_v48, %v1828_v34  ;;  %v682_v51 = vpop.f32.mrb[5].mxu0 }
 0x117   : > { %v740_v52 = vadd.f32 %v1828_v34, %v682_v51  ;;  %v1384_v53 = vpop.f32.mrb[6].mxu0  ;;  %1409 = vmatprep.mubr.bf16.mxu1 %v768_v49 }
 0x118   : > { %v743_v54 = vadd.f32 %v1384_v53, %v1828_v34  ;;  %v685_v55 = vpop.f32.mrb[7].mxu0  ;;  %1410 = vmatmul.mubr.bf16.vlgmr.msra.gmra.mrb[0].mxu1 %v769_v47  ;;  %v758_v57 = vmax.f32 %v742_v50, 0.0 }
 0x119   : > { %v741_v56 = vadd.f32 %v1828_v34, %v685_v55  ;;  %1465 = vmatpush3.bf16.msra.mxu1 %v1557_v28  ;;  %v756_v59 = vmax.f32 %v740_v52, 0.0  ;;  %v1564_v28 = vld [vmem:[%s1944_s7 + $0x38] sm:$0xff]  }
 0x11a   : > { %v759_v58 = vmax.f32 %v743_v54, 0.0  ;;  %1458 = vmatprep.subr.bf16.mxu1 %v1558_v29  ;;  %1439 = vmatprep.subr.bf16.mxu0 %v1564_v28 }
 0x11b   : > { %v757_v60 = vmax.f32 %v741_v56, 0.0  ;;  %1440 = vmatpush3.bf16.msra.mxu0 %v1564_v28 }
 0x11c   : > { %v771_v61 = vpack.c.bf16 %v759_v58, %v758_v57 }
 0x11d   : > { %v770_v62 = vpack.c.bf16 %v757_v60, %v756_v59  ;;  %v1387_v63 = vpop.f32.mrb[8].mxu0  ;;  %1466 = vmatpush3.bf16.msra.mxu1 %v1558_v29  ;;  %v1283_v29 = vld [vmem:[%s1943_s6] ss:$0 sm:$0xff] }
 0x11e   : > { %v746_v0 = vadd.f32 %v1387_v63, %v1828_v34  ;;  %v698_v1 = vpop.f32.mrb[9].mxu0  ;;  %1459 = vmatprep.subr.bf16.mxu1 %v1559_v30 }
 0x11f   : > { %v744_v2 = vadd.f32 %v1828_v34, %v698_v1  ;;  %v1388_v3 = vpop.f32.mrb[10].mxu0  ;;  %1413 = vmatprep.mubr.bf16.mxu1 %v770_v62 }
 0x120   : > { %v747_v4 = vadd.f32 %v1388_v3, %v1828_v34  ;;  %v701_v5 = vpop.f32.mrb[11].mxu0  ;;  %1414 = vmatmul.mubr.bf16.gmra.mrb[4].mxu1 %v771_v61  ;;  %v762_v7 = vmax.f32 %v746_v0, 0.0 }
 0x121   : > { %v745_v6 = vadd.f32 %v1828_v34, %v701_v5  ;;  %1467 = vmatpush3.bf16.msra.mxu1 %v1559_v30  ;;  %v760_v9 = vmax.f32 %v744_v2, 0.0 }
 0x122   : > { %v763_v8 = vmax.f32 %v747_v4, 0.0  ;;  %1460 = vmatprep.subr.bf16.mxu1 %v1807_v31 }
 0x123   : > { %v761_v10 = vmax.f32 %v745_v6, 0.0 }
 0x124   : > { %v773_v11 = vpack.c.bf16 %v763_v8, %v762_v7 }
 0x125   : > { %v772_v12 = vpack.c.bf16 %v761_v10, %v760_v9  ;;  %v1391_v13 = vpop.f32.mrb[12].mxu0  ;;  %1468 = vmatpush3.bf16.msra.mxu1 %v1807_v31 }
 0x126   : > { %v750_v14 = vadd.f32 %v1391_v13, %v1828_v34  ;;  %v714_v15 = vpop.f32.mrb[13].mxu0  ;;  %1461 = vmatprep.subr.bf16.mxu1 %v1813_v32 }
 0x127   : > { %v748_v16 = vadd.f32 %v1828_v34, %v714_v15  ;;  %v1392_v17 = vpop.f32.mrb[14].mxu0  ;;  %1417 = vmatprep.mubr.bf16.mxu1 %v772_v12 }
 0x128   : > { %v751_v18 = vadd.f32 %v1392_v17, %v1828_v34  ;;  %v717_v19 = vpop.f32.mrb[15].mxu0  ;;  %1418 = vmatmul.mubr.bf16.gmra.mrb[8].mxu1 %v773_v11  ;;  %v766_v21 = vmax.f32 %v750_v14, 0.0 }
 0x129   : > { %v749_v20 = vadd.f32 %v1828_v34, %v717_v19  ;;  %1469 = vmatpush3.bf16.msra.mxu1 %v1813_v32  ;;  %v764_v23 = vmax.f32 %v748_v16, 0.0 }
 0x12a   : > { %v767_v22 = vmax.f32 %v751_v18, 0.0  ;;  %1462 = vmatprep.subr.bf16.mxu1 %v1820_v33 }
 0x12b   : > { %v765_v24 = vmax.f32 %v749_v20, 0.0 }
 0x12c   : > { %v775_v25 = vpack.c.bf16 %v767_v22, %v766_v21  ;;  %v1292_v22 = vld [vmem:[%s1945_s8] ss:$0 sm:$0xff] }
 0x12d   : > { %v774_v26 = vpack.c.bf16 %v765_v24, %v764_v23  ;;  %1470 = vmatpush3.bf16.msra.mxu1 %v1820_v33 }
 0x12e   : > { %1463 = vmatprep.subr.bf16.mxu1 %v1563_v27 }
 0x12f   : > { %1421 = vmatprep.mubr.bf16.mxu1 %v774_v26 }
 0x130   : > { %1422 = vmatmul.mubr.bf16.gmra.mrb[12].mxu1 %v775_v25 }
 0x131   : > { %1471 = vmatpush3.bf16.msra.mxu1 %v1563_v27 }
 0x132   : > { %1464 = vmatprep.subr.bf16.mxu1 %v1564_v28 }
 0x135   : > { %1472 = vmatpush3.bf16.msra.mxu1 %v1564_v28 }
 0x1eb   : > { %v1411_v30 = vpop.f32.mrb[0].mxu1 }
 0x1ec   : > { %v890_v31 = vadd.f32 %v1411_v30, %v1283_v29  ;;  %v881_v32 = vpop.f32.mrb[1].mxu1 }
 0x1ed   : > { %v882_v33 = vadd.f32 %v1283_v29, %v881_v32  ;;  %v1412_v34 = vpop.f32.mrb[2].mxu1 }
 0x1ee   : > { %v893_v35 = vadd.f32 %v1412_v34, %v1283_v29  ;;  %v884_v36 = vpop.f32.mrb[3].mxu1  ;;  %v946_v38 = vmax.f32 %v890_v31, 0.0 }
 0x1ef   : > { %v885_v37 = vadd.f32 %v1283_v29, %v884_v36  ;;  %v944_v40 = vmax.f32 %v882_v33, 0.0 }
 0x1f0   : > { %v947_v39 = vmax.f32 %v893_v35, 0.0 }
 0x1f1   : > { %v945_v41 = vmax.f32 %v885_v37, 0.0 }
 0x1f2   : > { %v961_v42 = vpack.c.bf16 %v947_v39, %v946_v38 }
 0x1f3   : > { %v960_v43 = vpack.c.bf16 %v945_v41, %v944_v40  ;;  %v1415_v44 = vpop.f32.mrb[4].mxu1 }
 0x1f4   : > { %v906_v45 = vadd.f32 %v1415_v44, %v1283_v29  ;;  %v897_v46 = vpop.f32.mrb[5].mxu1 }
 0x1f5   : > { %v898_v47 = vadd.f32 %v1283_v29, %v897_v46  ;;  %v1416_v48 = vpop.f32.mrb[6].mxu1  ;;  %1441 = vmatprep.mubr.bf16.mxu0 %v960_v43 }
 0x1f6   : > { %v909_v49 = vadd.f32 %v1416_v48, %v1283_v29  ;;  %v900_v50 = vpop.f32.mrb[7].mxu1  ;;  %1442 = vmatmul.mubr.bf16.vlgmr.msra.gmra.mrb[16].mxu0 %v961_v42  ;;  %v950_v52 = vmax.f32 %v906_v45, 0.0 }
 0x1f7   : > { %v901_v51 = vadd.f32 %v1283_v29, %v900_v50  ;;  %v948_v54 = vmax.f32 %v898_v47, 0.0 }
 0x1f8   : > { %v951_v53 = vmax.f32 %v909_v49, 0.0 }
 0x1f9   : > { %v949_v55 = vmax.f32 %v901_v51, 0.0 }
 0x1fa   : > { %v963_v56 = vpack.c.bf16 %v951_v53, %v950_v52 }
 0x1fb   : > { %v962_v57 = vpack.c.bf16 %v949_v55, %v948_v54  ;;  %v1419_v58 = vpop.f32.mrb[8].mxu1 }
 0x1fc   : > { %v922_v59 = vadd.f32 %v1419_v58, %v1283_v29  ;;  %v913_v60 = vpop.f32.mrb[9].mxu1 }
 0x1fd   : > { %v914_v61 = vadd.f32 %v1283_v29, %v913_v60  ;;  %v1420_v62 = vpop.f32.mrb[10].mxu1  ;;  %1445 = vmatprep.mubr.bf16.mxu1 %v962_v57 }
 0x1fe   : > { %v925_v63 = vadd.f32 %v1420_v62, %v1283_v29  ;;  %v916_v0 = vpop.f32.mrb[11].mxu1  ;;  %1446 = vmatmul.mubr.bf16.vlgmr.msra.gmra.mrb[16].mxu1 %v963_v56  ;;  %v954_v2 = vmax.f32 %v922_v59, 0.0 }
 0x1ff   : > { %v917_v1 = vadd.f32 %v1283_v29, %v916_v0  ;;  %v952_v4 = vmax.f32 %v914_v61, 0.0 }
 0x200   : > { %v955_v3 = vmax.f32 %v925_v63, 0.0 }
 0x201   : > { %v953_v5 = vmax.f32 %v917_v1, 0.0 }
 0x202   : > { %v965_v6 = vpack.c.bf16 %v955_v3, %v954_v2 }
 0x203   : > { %v964_v7 = vpack.c.bf16 %v953_v5, %v952_v4  ;;  %v1423_v8 = vpop.f32.mrb[12].mxu1 }
 0x204   : > { %v938_v9 = vadd.f32 %v1423_v8, %v1283_v29  ;;  %v929_v10 = vpop.f32.mrb[13].mxu1 }
 0x205   : > { %v930_v11 = vadd.f32 %v1283_v29, %v929_v10  ;;  %v1424_v12 = vpop.f32.mrb[14].mxu1  ;;  %1449 = vmatprep.mubr.bf16.mxu1 %v964_v7 }
 0x206   : > { %v941_v13 = vadd.f32 %v1424_v12, %v1283_v29  ;;  %v932_v14 = vpop.f32.mrb[15].mxu1  ;;  %1450 = vmatmul.mubr.bf16.gmra.mrb[20].mxu1 %v965_v6  ;;  %v958_v16 = vmax.f32 %v938_v9, 0.0 }
 0x207   : > { %v933_v15 = vadd.f32 %v1283_v29, %v932_v14  ;;  %v956_v18 = vmax.f32 %v930_v11, 0.0 }
 0x208   : > { %v959_v17 = vmax.f32 %v941_v13, 0.0 }
 0x209   : > { %v957_v19 = vmax.f32 %v933_v15, 0.0 }
 0x20a   : > { %v967_v20 = vpack.c.bf16 %v959_v17, %v958_v16 }
 0x20b   : > { %v966_v21 = vpack.c.bf16 %v957_v19, %v956_v18 }
 0x20d   : > { %1453 = vmatprep.mubr.bf16.mxu1 %v966_v21 }
 0x20e   : > { %1454 = vmatmul.mubr.bf16.gmra.mrb[24].mxu1 %v967_v20 }
 0x2c9   : > { %v1443_v23 = vpop.f32.mrb[16].mxu0 }
 0x2ca   : > { %v1082_v24 = vadd.f32 %v1443_v23, %v1292_v22  ;;  %v1073_v25 = vpop.f32.mrb[17].mxu0 }
 0x2cb   : > { %v1074_v26 = vadd.f32 %v1292_v22, %v1073_v25  ;;  %v1444_v27 = vpop.f32.mrb[18].mxu0 }
 0x2cc   : > { %1138 = vst [vmem:[%s1867_s25 + $0x10] sm:$0xff] %v1082_v24  ;;  %v1085_v28 = vadd.f32 %v1444_v27, %v1292_v22  ;;  %v1076_v29 = vpop.f32.mrb[19].mxu0 }
 0x2cd   : > { %1136 = vst [vmem:[%s1867_s25] sm:$0xff] %v1074_v26  ;;  %v1077_v30 = vadd.f32 %v1292_v22, %v1076_v29 }
 0x2ce   : > { %1139 = vst [vmem:[%s1867_s25 + $0x18] sm:$0xff] %v1085_v28 }
 0x2cf   : > { %1137 = vst [vmem:[%s1867_s25 + $0x8] sm:$0xff] %v1077_v30 }
 0x2d1   : > { %v1447_v31 = vpop.f32.mrb[16].mxu1 }
 0x2d2   : > { %v1098_v32 = vadd.f32 %v1447_v31, %v1292_v22  ;;  %v1089_v33 = vpop.f32.mrb[17].mxu1 }
 0x2d3   : > { %v1090_v34 = vadd.f32 %v1292_v22, %v1089_v33  ;;  %v1448_v35 = vpop.f32.mrb[18].mxu1 }
 0x2d4   : > { %1142 = vst [vmem:[%s1867_s25 + $0x30] sm:$0xff] %v1098_v32  ;;  %v1101_v36 = vadd.f32 %v1448_v35, %v1292_v22  ;;  %v1092_v37 = vpop.f32.mrb[19].mxu1 }
 0x2d5   : > { %1140 = vst [vmem:[%s1867_s25 + $0x20] sm:$0xff] %v1090_v34  ;;  %v1093_v38 = vadd.f32 %v1292_v22, %v1092_v37 }
 0x2d6   : > { %1143 = vst [vmem:[%s1867_s25 + $0x38] sm:$0xff] %v1101_v36 }
 0x2d7   : > { %1141 = vst [vmem:[%s1867_s25 + $0x28] sm:$0xff] %v1093_v38 }
 0x2d9   : > { %v1451_v39 = vpop.f32.mrb[20].mxu1 }
 0x2da   : > { %v1114_v40 = vadd.f32 %v1451_v39, %v1292_v22  ;;  %v1105_v41 = vpop.f32.mrb[21].mxu1 }
 0x2db   : > { %v1106_v42 = vadd.f32 %v1292_v22, %v1105_v41  ;;  %v1452_v43 = vpop.f32.mrb[22].mxu1 }
 0x2dc   : > { %1146 = vst [vmem:[%s1867_s25 + $0x50] sm:$0xff] %v1114_v40  ;;  %v1117_v44 = vadd.f32 %v1452_v43, %v1292_v22  ;;  %v1108_v45 = vpop.f32.mrb[23].mxu1 }
 0x2dd   : > { %1144 = vst [vmem:[%s1867_s25 + $0x40] sm:$0xff] %v1106_v42  ;;  %v1109_v46 = vadd.f32 %v1292_v22, %v1108_v45 }
 0x2de   : > { %1147 = vst [vmem:[%s1867_s25 + $0x58] sm:$0xff] %v1117_v44 }
 0x2df   : > { %1145 = vst [vmem:[%s1867_s25 + $0x48] sm:$0xff] %v1109_v46 }
 0x2e1   : > { %v1455_v47 = vpop.f32.mrb[24].mxu1 }
 0x2e2   : > { %v1130_v48 = vadd.f32 %v1455_v47, %v1292_v22  ;;  %v1121_v49 = vpop.f32.mrb[25].mxu1 }
 0x2e3   : > { %v1122_v50 = vadd.f32 %v1292_v22, %v1121_v49  ;;  %v1456_v51 = vpop.f32.mrb[26].mxu1 }
 0x2e4   : > { %1150 = vst [vmem:[%s1867_s25 + $0x70] sm:$0xff] %v1130_v48  ;;  %v1133_v52 = vadd.f32 %v1456_v51, %v1292_v22  ;;  %v1124_v53 = vpop.f32.mrb[27].mxu1 }
 0x2e5   : > { %1148 = vst [vmem:[%s1867_s25 + $0x60] sm:$0xff] %v1122_v50  ;;  %v1125_v54 = vadd.f32 %v1292_v22, %v1124_v53 }
 0x2e6   : > { %1151 = vst [vmem:[%s1867_s25 + $0x78] sm:$0xff] %v1133_v52 }
 0x2e7   : > { %1149 = vst [vmem:[%s1867_s25 + $0x68] sm:$0xff] %v1125_v54 }
 0x2e8   : > { %1578 = shalt.err (!%p1575_p3)
}
 0x2e9   : > { %s1579_s21 = scalar_lea.hbm %s1887_s16, 2048  ;;  %s1583_s26 = scalar_lea.hbm %s1946_s9, 6144 }
 0x2ea   : > { %p1580_p4 = scmp.ne.s32.totalorder %s1887_s16, %s1579_s21  ;;  %p1584_p9 = scmp.lt.u32.totalorder %s1887_s16, %s1946_s9 }
 0x2eb   : > { %p1585_p10 = scmp.lt.u32.totalorder %s1583_s26, %s1579_s21  ;;  %p1587_p12 = scmp.lt.u32.totalorder %s1579_s21, %s1887_s16 }
 0x2ec   : > { %p1581_p7 = pnand %p1580_p4, %p1720_p5 }
 0x2ed   : > { %p1586_p11 = por %p1585_p10, %p1584_p9 }
 0x2ee   : > { %p1582_p8 = pneg %p1581_p7 }
 0x2ef   : > { %p1588_p13 = por %p1587_p12, %p1586_p11 }
 0x2f1   : > { %p1589_p0 = pnand %p1588_p13, %p1582_p8 }
 0x2f3   : > { %1592 = shalt.err (!%p1589_p0)
}
 0x2f4   : > { %s1630_s17 = smov 128   ;;  %s1631_s14 = smov 8  }
 0x2f5   : > { %1491 = dma.vmem_to_hbm [thread:$0]  (%p1720_p5), %s1889_s27, 2048, %s1887_s16, %s1896_s13, %s1630_s17, %s1630_s17, %s1631_s14  }
 0x2f6 PF: > { %p1497_p1 = scmp.ge.s32.totalorder %s1627_s12, 2  ;;  %s1181_s22 = sand.u32 1, %s1615_s30  }
 0x2f7   : > { %s1182_s24 = scalar_lea.sflag [#allocation3], %s1181_s22 }
 0x2f8   : > { %p1494_p2 = pnand %p1497_p1, %p1724_p6 }
 0x2fa   : > { %1610 = dma.done.wait (!%p1494_p2), %s1182_s24, 2048  }
 0x2fb   : > { %1612 = vsyncadd (!%p1494_p2), %s1182_s24, 4294965248  ;;  %p19_p3 = scmp.ge.s32.totalorder %s1707_s15, 5   ;;  %s1949_s30 = smov %s1619_s10 }
 0x2fc   : > { %s1950_s10 = smov %s1623_s11  ;;  %s1951_s11 = smov %s1718_s18 }
 0x2fd   : > { %s1952_s12 = smov %s1707_s15  ;;  %21 = sbr.rel (!%p19_p3) target bundleno = 3 (0x3), region = 94 }
 0x304   :  { %1187 = vsyncpa [#allocation3], 1 }
 0x305   :  { %1189 = vsyncpa [#allocation3 + $0x1], 1 }

</bundles_post_ra>
